<compile_context>
chip_gen: v7x
topology: tpu7x:2x2x1
jax: 0.10.0
libtpu: 0.0.40
codegen_flags: <defaults>
</compile_context>

<pallas_src>
import functools

import jax
import jax.numpy as jnp
from jax.experimental import pallas as pl
from jax.experimental.pallas import tpu as pltpu


def _round_up(x, m):
    return ((x + m - 1) // m) * m


@functools.lru_cache(maxsize=1)
def _device_vmem_capacity_bytes():
    """Physical VMEM per TensorCore; conservative 64 MiB (v7x) if query unavailable."""
    try:
        return int(pltpu.get_tpu_info().vmem_capacity_bytes)
    except Exception:
        return 64 * 1024 * 1024


def ffn_kernel(x_ref, w1_ref, b1_ref, w2_ref, b2_ref, g_ref, beta_ref, o_ref, acc_ref):
    # x_ref: (TM, D) activation dtype; w1_ref: (D, TF) bf16; b1_ref: (1, TF) f32;
    # w2_ref: (TF, D) bf16; b2_ref/g_ref/beta_ref: (1, D) f32;
    # o_ref: (TM, D); acc_ref: (TM, D) f32 scratch (resident across the j axis).
    j = pl.program_id(1)

    @pl.when(j == 0)
    def _():
        # Initialize the accumulator with the second-layer bias (saves an epilogue add).
        acc_ref[...] = jnp.broadcast_to(b2_ref[...], acc_ref.shape)

    x = x_ref[...]
    xm = x.astype(w1_ref.dtype)  # bf16 for the MXU

    # w_1 tile + ReLU (bf16 MXU matmul, f32 accumulation).
    h = jnp.dot(xm, w1_ref[...], preferred_element_type=jnp.float32)
    h = jnp.maximum(h + b1_ref[...], 0.0)
    # dropout (inference) == identity

    # w_2 tile, accumulated over d_ff tiles in the f32 scratch.
    acc_ref[...] += jnp.dot(h.astype(w2_ref.dtype), w2_ref[...],
                            preferred_element_type=jnp.float32)

    @pl.when(j == pl.num_programs(1) - 1)
    def _():
        # dropout (inference) == identity
        # Residual + LayerNorm (eps = 1e-5, nn.LayerNorm default), one-pass stats, f32.
        z = x.astype(jnp.float32) + acc_ref[...]
        d = z.shape[-1]
        s1 = jnp.sum(z, axis=-1, keepdims=True)
        s2 = jnp.sum(z * z, axis=-1, keepdims=True)
        mean = s1 / d
        var = s2 / d - mean * mean
        inv = jax.lax.rsqrt(var + 1e-5)
        out = (z - mean) * inv * g_ref[...] + beta_ref[...]
        o_ref[...] = out.astype(o_ref.dtype)


def prepare_params(w1, b1, w2, b2, gamma, beta, *, tile_ff=1024,
                   matmul_dtype=jnp.bfloat16):
    """One-time weight preparation (outside the hot path).

    Pads d_ff to a multiple of the chosen d_ff tile (zero padding -> exact result),
    casts the large matrices to the MXU dtype (bf16), keeps small vectors in f32 and
    reshapes them to (1, dim) rows. Returns (params, tf) where tf is the d_ff tile size
    to pass to feed_forward as tile_ff.
    """
    D, F = w1.shape
    if F <= max(tile_ff, 128):
        tf = F if F < 128 else _round_up(F, 128)      # single d_ff tile
    else:
        tf = _round_up(tile_ff, 128)
    F_pad = _round_up(F, tf)
    if F_pad != F:
        # Zero-padded d_ff columns contribute ReLU(0)=0 through w_2 -> exact result.
        w1 = jnp.pad(w1, ((0, 0), (0, F_pad - F)))
        b1 = jnp.pad(b1, ((0, F_pad - F),))
        w2 = jnp.pad(w2, ((0, F_pad - F), (0, 0)))

    w1 = w1.astype(matmul_dtype)
    w2 = w2.astype(matmul_dtype)
    b1_2 = b1.reshape(1, F_pad).astype(jnp.float32)
    b2_2 = b2.reshape(1, D).astype(jnp.float32)
    g_2 = gamma.reshape(1, D).astype(jnp.float32)
    be_2 = beta.reshape(1, D).astype(jnp.float32)
    return (w1, b1_2, w2, b2_2, g_2, be_2), tf


@functools.partial(jax.jit, static_argnames=("tile_rows", "tile_ff"))
def feed_forward(x, w1, b1, w2, b2, gamma, beta, *, tile_rows=512, tile_ff=1024):
    """x: (B, S, D). Params as produced by prepare_params (w1: (D, F_pad) bf16, etc.).

    Note: matmuls run in bf16 with f32 accumulation (mixed precision), so results differ
    from a pure-f32 reference at the ~1e-2 level.
    """
    B, S, D = x.shape
    F_pad = w1.shape[1]
    N = B * S

    # Row tiling: dtype-aware sublane multiple (8 for f32, 16 for bf16, 32 for 8-bit).
    sub = 8 * max(1, 4 // jnp.dtype(x.dtype).itemsize)
    tm = max(sub, min(_round_up(tile_rows, sub), _round_up(N, sub)))

    # d_ff tiling: one (D, tf)+(tf, D) weight tile pair resident at a time.
    tf = min(tile_ff, F_pad)
    assert F_pad % tf == 0, "pass the tile_ff returned by prepare_params"

    act_b = jnp.dtype(x.dtype).itemsize
    w_b = jnp.dtype(w1.dtype).itemsize

    def _est(tm_, tf_):
        return (2 * tm_ * D * act_b              # x tiles (double-buffered)
                + 2 * tm_ * D * act_b            # out tiles
                + 2 * (D * tf_ + tf_ * D) * w_b  # w1/w2 tiles (double-buffered)
                + 2 * (tf_ + 3 * D) * 4          # bias / layernorm rows
                + tm_ * D * 4)                   # f32 accumulator scratch

    # Keep the working set inside ~85% of the device's VMEM (64 MiB fallback for v7x);
    # shrink the row tile (never tf: it must keep dividing F_pad) until it fits.
    budget = int(0.85 * _device_vmem_capacity_bytes())
    while _est(tm, tf) > budget and tm > sub:
        tm = max(sub, _round_up(tm // 2, sub))
    vmem_limit = int(min(budget, max(32 * 1024 * 1024, 2 * _est(tm, tf))))

    # Ragged last row block handled by Pallas partial tiles (no activation pad/slice);
    # garbage rows in the padded region are never stored and never mix across rows.
    n_row_blocks = pl.cdiv(N, tm)          # >= 2 recommended on v7x for megacore
    n_ff_blocks = F_pad // tf

    x2 = x.reshape(N, D)

    out = pl.pallas_call(
        ffn_kernel,
        out_shape=jax.ShapeDtypeStruct((N, D), x.dtype),
        grid_spec=pltpu.PrefetchScalarGridSpec(
            num_scalar_prefetch=0,
            grid=(n_row_blocks, n_ff_blocks),
            in_specs=[
                pl.BlockSpec((tm, D), lambda i, j: (i, 0)),   # x rows (reused across j)
                pl.BlockSpec((D, tf), lambda i, j: (0, j)),   # w1 tile (bf16)
                pl.BlockSpec((1, tf), lambda i, j: (0, j)),   # b1 tile
                pl.BlockSpec((tf, D), lambda i, j: (j, 0)),   # w2 tile (bf16)
                pl.BlockSpec((1, D), lambda i, j: (0, 0)),    # b2
                pl.BlockSpec((1, D), lambda i, j: (0, 0)),    # layernorm gamma
                pl.BlockSpec((1, D), lambda i, j: (0, 0)),    # layernorm beta
            ],
            out_specs=pl.BlockSpec((tm, D), lambda i, j: (i, 0)),
            scratch_shapes=[pltpu.VMEM((tm, D), jnp.float32)],
        ),
        compiler_params=pltpu.CompilerParams(
            dimension_semantics=("parallel", "arbitrary"),
            vmem_limit_bytes=vmem_limit,
        ),
    )(x2, w1, b1, w2, b2, gamma, beta)

    return out.reshape(B, S, D)


def init_params(key, d_model, d_ff):
    """Deterministic init mirroring nn.Linear / nn.LayerNorm default shapes."""
    k1, k2, k3, k4 = jax.random.split(key, 4)
    bound1 = 1.0 / (d_model ** 0.5)
    bound2 = 1.0 / (d_ff ** 0.5)
    # stored as (in, out) == PyTorch weight.T
    w1 = jax.random.uniform(k1, (d_model, d_ff), jnp.float32, -bound1, bound1)
    b1 = jax.random.uniform(k2, (d_ff,), jnp.float32, -bound1, bound1)
    w2 = jax.random.uniform(k3, (d_ff, d_model), jnp.float32, -bound2, bound2)
    b2 = jax.random.uniform(k4, (d_model,), jnp.float32, -bound2, bound2)
    gamma = jnp.ones((d_model,), jnp.float32)
    beta = jnp.zeros((d_model,), jnp.float32)
    return w1, b1, w2, b2, gamma, beta


def reference(x, w1, b1, w2, b2, gamma, beta):
    h = jnp.maximum(x @ w1 + b1, 0.0)
    y = h @ w2 + b2
    z = x + y
    mean = jnp.mean(z, axis=-1, keepdims=True)
    var = jnp.mean((z - mean) ** 2, axis=-1, keepdims=True)
    return (z - mean) / jnp.sqrt(var + 1e-5) * gamma + beta


if __name__ == "__main__":
    batch, seq, d_model, d_ff = 2, 8, 32, 64

    key = jax.random.PRNGKey(0)
    kx, kp = jax.random.split(key)
    x = jax.random.normal(kx, (batch, seq, d_model), jnp.float32)
    w1, b1, w2, b2, gamma, beta = init_params(kp, d_model, d_ff)

    params, tf = prepare_params(w1, b1, w2, b2, gamma, beta)
    out = feed_forward(x, *params, tile_ff=tf)
    out = jax.block_until_ready(out)

    ref = reference(x, w1, b1, w2, b2, gamma, beta)
    assert out.shape == x.shape
    assert not bool(jnp.any(jnp.isnan(out)))
    # bf16 MXU matmuls with f32 accumulation -> mixed-precision tolerance vs f32 reference.
    assert jnp.allclose(out, ref, atol=3e-2, rtol=3e-2), "mismatch vs reference"

    print("KERNEL_OK")
</pallas_src>

<mosaic_0001>
module attributes {stable_mosaic.version = 11 : i64} {
  func.func @ffn_kernel(%arg0: i32, %arg1: i32, %arg2: memref<16x32xf32, #tpu.memory_space<vmem>>, %arg3: memref<32x64xbf16, #tpu.memory_space<vmem>>, %arg4: memref<1x64xf32, #tpu.memory_space<vmem>>, %arg5: memref<64x32xbf16, #tpu.memory_space<vmem>>, %arg6: memref<1x32xf32, #tpu.memory_space<vmem>>, %arg7: memref<1x32xf32, #tpu.memory_space<vmem>>, %arg8: memref<1x32xf32, #tpu.memory_space<vmem>>, %arg9: memref<16x32xf32, #tpu.memory_space<vmem>>, %arg10: memref<16x32xf32, #tpu.memory_space<vmem>>) attributes {dimension_semantics = [#tpu.dimension_semantics<parallel>, #tpu.dimension_semantics<arbitrary>], iteration_bounds = array<i64: 1, 1>, scalar_prefetch = 0 : i64, scratch_operands = 1 : i64, tpu.core_type = #tpu.core_type<tc>, window_params = [{transform_indices = @transform_0, window_bounds = array<i64: 16, 32>}, {transform_indices = @transform_1, window_bounds = array<i64: 32, 64>}, {transform_indices = @transform_2, window_bounds = array<i64: 1, 64>}, {transform_indices = @transform_3, window_bounds = array<i64: 64, 32>}, {pipeline_mode = #tpu.pipeline_mode<synchronous>, transform_indices = @transform_4, window_bounds = array<i64: 1, 32>}, {pipeline_mode = #tpu.pipeline_mode<synchronous>, transform_indices = @transform_5, window_bounds = array<i64: 1, 32>}, {pipeline_mode = #tpu.pipeline_mode<synchronous>, transform_indices = @transform_6, window_bounds = array<i64: 1, 32>}, {transform_indices = @transform_7, window_bounds = array<i64: 16, 32>}]} {
    %c0_i32 = arith.constant 0 : i32
    %0 = arith.cmpi eq, %arg1, %c0_i32 : i32
    %1 = arith.extui %0 : i1 to i32
    %c0_i32_0 = arith.constant 0 : i32
    %2 = arith.cmpi ne, %1, %c0_i32_0 : i32
    scf.if %2 {
      %c0_16 = arith.constant 0 : index
      %c0_17 = arith.constant 0 : index
      %21 = vector.load %arg6[%c0_16, %c0_17] : memref<1x32xf32, #tpu.memory_space<vmem>>, vector<1x32xf32>
      %22 = vector.shape_cast %21 : vector<1x32xf32> to vector<1x32xf32>
      %23 = vector.broadcast %22 : vector<1x32xf32> to vector<16x32xf32>
      %c0_18 = arith.constant 0 : index
      %c0_19 = arith.constant 0 : index
      %24 = vector.load %arg10[%c0_18, %c0_19] : memref<16x32xf32, #tpu.memory_space<vmem>>, vector<16x32xf32>
      tpu.vector_store %arg10[%c0_18, %c0_19], %23 {strides = array<i32>} : memref<16x32xf32, #tpu.memory_space<vmem>>, vector<16x32xf32>,
    } else {
    }
    %c0 = arith.constant 0 : index
    %c0_1 = arith.constant 0 : index
    %3 = vector.load %arg2[%c0, %c0_1] : memref<16x32xf32, #tpu.memory_space<vmem>>, vector<16x32xf32>
    %4 = arith.truncf %3 : vector<16x32xf32> to vector<16x32xbf16>
    %c0_2 = arith.constant 0 : index
    %c0_3 = arith.constant 0 : index
    %5 = vector.load %arg3[%c0_2, %c0_3] : memref<32x64xbf16, #tpu.memory_space<vmem>>, vector<32x64xbf16>
    %cst = arith.constant dense<0.000000e+00> : vector<16x64xf32>
    %6 = tpu.matmul %4, %5, %cst {dimension_numbers = #tpu.dot_dimension_numbers<[1], [0], [0], [1], [0, 0, 1, 1], [], []>} : vector<16x32xbf16>, vector<32x64xbf16>, vector<16x64xf32> -> vector<16x64xf32>
    %c0_4 = arith.constant 0 : index
    %c0_5 = arith.constant 0 : index
    %7 = vector.load %arg4[%c0_4, %c0_5] : memref<1x64xf32, #tpu.memory_space<vmem>>, vector<1x64xf32>
    %8 = vector.broadcast %7 : vector<1x64xf32> to vector<16x64xf32>
    %9 = arith.addf %6, %8 : vector<16x64xf32>
    %cst_6 = arith.constant 0.000000e+00 : f32
    %10 = vector.broadcast %cst_6 : f32 to vector<16x64xf32>
    %11 = arith.maximumf %9, %10 : vector<16x64xf32>
    %c0_7 = arith.constant 0 : index
    %c0_8 = arith.constant 0 : index
    %12 = vector.load %arg10[%c0_7, %c0_8] : memref<16x32xf32, #tpu.memory_space<vmem>>, vector<16x32xf32>
    %13 = arith.truncf %11 : vector<16x64xf32> to vector<16x64xbf16>
    %c0_9 = arith.constant 0 : index
    %c0_10 = arith.constant 0 : index
    %14 = vector.load %arg5[%c0_9, %c0_10] : memref<64x32xbf16, #tpu.memory_space<vmem>>, vector<64x32xbf16>
    %cst_11 = arith.constant dense<0.000000e+00> : vector<16x32xf32>
    %15 = tpu.matmul %13, %14, %cst_11 {dimension_numbers = #tpu.dot_dimension_numbers<[1], [0], [0], [1], [0, 0, 1, 1], [], []>} : vector<16x64xbf16>, vector<64x32xbf16>, vector<16x32xf32> -> vector<16x32xf32>
    %16 = arith.addf %12, %15 : vector<16x32xf32>
    %c0_12 = arith.constant 0 : index
    %c0_13 = arith.constant 0 : index
    %17 = vector.load %arg10[%c0_12, %c0_13] : memref<16x32xf32, #tpu.memory_space<vmem>>, vector<16x32xf32>
    tpu.vector_store %arg10[%c0_12, %c0_13], %16 {strides = array<i32>} : memref<16x32xf32, #tpu.memory_space<vmem>>, vector<16x32xf32>,
    %c0_i32_14 = arith.constant 0 : i32
    %18 = arith.cmpi eq, %arg1, %c0_i32_14 : i32
    %19 = arith.extui %18 : i1 to i32
    %c0_i32_15 = arith.constant 0 : i32
    %20 = arith.cmpi ne, %19, %c0_i32_15 : i32
    scf.if %20 {
      %c0_16 = arith.constant 0 : index
      %c0_17 = arith.constant 0 : index
      %21 = vector.load %arg10[%c0_16, %c0_17] : memref<16x32xf32, #tpu.memory_space<vmem>>, vector<16x32xf32>
      %22 = arith.addf %3, %21 : vector<16x32xf32>
      %cst_18 = arith.constant dense<0.000000e+00> : vector<16xf32>
      %23 = vector.multi_reduction <add>, %22, %cst_18 [1] : vector<16x32xf32> to vector<16xf32>
      %24 = vector.shape_cast %23 : vector<16xf32> to vector<16x1xf32>
      %25 = arith.mulf %22, %22 : vector<16x32xf32>
      %cst_19 = arith.constant dense<0.000000e+00> : vector<16xf32>
      %26 = vector.multi_reduction <add>, %25, %cst_19 [1] : vector<16x32xf32> to vector<16xf32>
      %27 = vector.shape_cast %26 : vector<16xf32> to vector<16x1xf32>
      %cst_20 = arith.constant 3.200000e+01 : f32
      %28 = vector.broadcast %cst_20 : f32 to vector<16x1xf32>
      %29 = arith.divf %24, %28 : vector<16x1xf32>
      %cst_21 = arith.constant 3.200000e+01 : f32
      %30 = vector.broadcast %cst_21 : f32 to vector<16x1xf32>
      %31 = arith.divf %27, %30 : vector<16x1xf32>
      %32 = arith.mulf %29, %29 : vector<16x1xf32>
      %33 = arith.subf %31, %32 : vector<16x1xf32>
      %cst_22 = arith.constant 9.99999974E-6 : f32
      %34 = vector.broadcast %cst_22 : f32 to vector<16x1xf32>
      %35 = arith.addf %33, %34 : vector<16x1xf32>
      %36 = math.rsqrt %35 : vector<16x1xf32>
      %37 = vector.broadcast %29 : vector<16x1xf32> to vector<16x32xf32>
      %38 = arith.subf %22, %37 : vector<16x32xf32>
      %39 = vector.broadcast %36 : vector<16x1xf32> to vector<16x32xf32>
      %40 = arith.mulf %38, %39 : vector<16x32xf32>
      %c0_23 = arith.constant 0 : index
      %c0_24 = arith.constant 0 : index
      %41 = vector.load %arg7[%c0_23, %c0_24] : memref<1x32xf32, #tpu.memory_space<vmem>>, vector<1x32xf32>
      %42 = vector.broadcast %41 : vector<1x32xf32> to vector<16x32xf32>
      %43 = arith.mulf %40, %42 : vector<16x32xf32>
      %c0_25 = arith.constant 0 : index
      %c0_26 = arith.constant 0 : index
      %44 = vector.load %arg8[%c0_25, %c0_26] : memref<1x32xf32, #tpu.memory_space<vmem>>, vector<1x32xf32>
      %45 = vector.broadcast %44 : vector<1x32xf32> to vector<16x32xf32>
      %46 = arith.addf %43, %45 : vector<16x32xf32>
      %c0_27 = arith.constant 0 : index
      %c0_28 = arith.constant 0 : index
      %47 = vector.load %arg9[%c0_27, %c0_28] : memref<16x32xf32, #tpu.memory_space<vmem>>, vector<16x32xf32>
      tpu.vector_store %arg9[%c0_27, %c0_28], %46 {strides = array<i32>} : memref<16x32xf32, #tpu.memory_space<vmem>>, vector<16x32xf32>,
    } else {
    }
    return
  }
  func.func @transform_0(%arg0: i32, %arg1: i32) -> (i32, i32) {
    %c0_i32 = arith.constant 0 : i32
    %c0_i32_0 = arith.constant 0 : i32
    return %arg0, %c0_i32 : i32, i32
  }
  func.func @transform_1(%arg0: i32, %arg1: i32) -> (i32, i32) {
    %c0_i32 = arith.constant 0 : i32
    %c0_i32_0 = arith.constant 0 : i32
    return %c0_i32, %arg1 : i32, i32
  }
  func.func @transform_2(%arg0: i32, %arg1: i32) -> (i32, i32) {
    %c0_i32 = arith.constant 0 : i32
    %c0_i32_0 = arith.constant 0 : i32
    return %c0_i32, %arg1 : i32, i32
  }
  func.func @transform_3(%arg0: i32, %arg1: i32) -> (i32, i32) {
    %c0_i32 = arith.constant 0 : i32
    %c0_i32_0 = arith.constant 0 : i32
    return %arg1, %c0_i32 : i32, i32
  }
  func.func @transform_4(%arg0: i32, %arg1: i32) -> (i32, i32) {
    %c0_i32 = arith.constant 0 : i32
    %c0_i32_0 = arith.constant 0 : i32
    %c0_i32_1 = arith.constant 0 : i32
    return %c0_i32, %c0_i32_0 : i32, i32
  }
  func.func @transform_5(%arg0: i32, %arg1: i32) -> (i32, i32) {
    %c0_i32 = arith.constant 0 : i32
    %c0_i32_0 = arith.constant 0 : i32
    %c0_i32_1 = arith.constant 0 : i32
    return %c0_i32, %c0_i32_0 : i32, i32
  }
  func.func @transform_6(%arg0: i32, %arg1: i32) -> (i32, i32) {
    %c0_i32 = arith.constant 0 : i32
    %c0_i32_0 = arith.constant 0 : i32
    %c0_i32_1 = arith.constant 0 : i32
    return %c0_i32, %c0_i32_0 : i32, i32
  }
  func.func @transform_7(%arg0: i32, %arg1: i32) -> (i32, i32) {
    %c0_i32 = arith.constant 0 : i32
    %c0_i32_0 = arith.constant 0 : i32
    return %arg0, %c0_i32 : i32, i32
  }
}

</mosaic_0001>

<bundles_post_ra>
// kernel: feed_forward.1
= control target key start
LH: loop header
LB: loop body
LE: loop exit
PB: predicated region body
PF: predicated region fallthrough
CT: control target
= control target key end

     0   :  { %v352_v1 = vmov 0.0   ;;  %vm353_vm0 = vmmov 0   ;;  %vm39_vm1 = vcmask 261120   ;;  %s456_s0 = inlined_call_operand.vmem [shape: f32[16,32], index: 0, kind: input, shape index: {}]   ;;  %s457_s1 = inlined_call_operand.vmem [shape: bf16[32,64], index: 1, kind: input, shape index: {}]   ;;  %s458_s2 = inlined_call_operand.vmem [shape: f32[1,64], index: 2, kind: input, shape index: {}]   ;;  %s459_s3 = inlined_call_operand.vmem [shape: bf16[64,32], index: 3, kind: input, shape index: {}]   ;;  %s460_s4 = inlined_call_operand.vmem [shape: f32[1,32], index: 4, kind: input, shape index: {}]   ;;  %s461_s5 = inlined_call_operand.vmem [shape: f32[1,32], index: 5, kind: input, shape index: {}]   ;;  %s462_s6 = inlined_call_operand.vmem [shape: f32[1,32], index: 6, kind: input, shape index: {}]   ;;  %s463_s7 = inlined_call_operand.hbm [shape: f32[16,32], index: 7, kind: output, shape index: {}]  }
   0x1   :  { %v318_v0 = vld [vmem:[%s457_s1] sm:$0xff]   ;;  %293 = vmatprep.subr.bf16.mxu0 %v352_v1  ;;  %v319_v2 = vld [vmem:[%s457_s1 + $0x8] sm:$0xff]   ;;  %301 = vmatprep.subr.bf16.mxu1 %v352_v1 }
   0x2   :  { %294 = vmatpush3.bf16.msra.mxu0 %v318_v0  ;;  %297 = vmatprep.mubr.msk.bf16.mxu0 %vm353_vm0, %v352_v1  ;;  %v42_v3 = vld [vmem:[%s456_s0] sm:$0xff]  ;;  %v43_v4 = vld [vmem:[%s456_s0 + $0x8] sm:$0xff] }
   0x3   :  { %295 = vmatprep.subr.bf16.mxu0 %v352_v1  ;;  %v320_v5 = vld [vmem:[%s459_s3] sm:$0xff]   ;;  %309 = vmatprep.mubr.msk.bf16.mxu1 %vm353_vm0, %v352_v1  ;;  %v321_v6 = vld [vmem:[%s459_s3 + $0x8] sm:$0xff]   ;;  %v44_v7 = vpack.c.bf16 %v43_v4, %v42_v3 }
   0x4   :  { %302 = vmatpush3.bf16.msra.mxu1 %v320_v5 }
   0x5   :  { %303 = vmatprep.subr.bf16.mxu1 %v352_v1 }
   0x6   :  { %296 = vmatpush3.bf16.msra.mxu0 %v319_v2 }
   0x7   :  { %12 = vsyncpa [#allocation4], 0  ;;  %v322_v8 = vld [vmem:[%s459_s3 + $0x10] sm:$0xff]   ;;  %v323_v9 = vld [vmem:[%s459_s3 + $0x18] sm:$0xff]   ;;  %vm150_vm2 = vcmask 523264   ;;  %s354_s20 = smov [#allocation3]  }
   0x8   :  { %304 = vmatpush3.bf16.msra.mxu1 %v321_v6  ;;  %v273_v10 = vld [vmem:[%s460_s4] ss:$0 sm:$0xff]  ;;  %s262_s21 = sshll.u32 %s354_s20, 4  ;;  %s263_s21 = int_to_ptr.vmem [resolvable:$true] %s262_s21 }
   0x9   :  { %298 = vmatmul.mubr.msk.bf16.vlgmr.msra.gmra.mrb[0].mxu0 %vm39_vm1, %v44_v7  ;;  %305 = vmatprep.subr.bf16.mxu1 %v352_v1  ;;  %40 = vst.msk [vmem:[#allocation2] sm:$0xff] %vm39_vm1, %v273_v10  ;;  %41 = vst.msk [vmem:[#allocation2 + $0x8] sm:$0xff] %vm39_vm1, %v273_v10  ;;  %v274_v11 = vld [vmem:[%s458_s2] ss:$0 sm:$0xff]  ;;  %p333_p1 = scmp.lt.s32.totalorder %s263_s21, %s263_s21 }
   0xa   :  { %v283_v55 = vld [vmem:[%s461_s5] ss:$0 sm:$0xff]  ;;  %s328_s5 = scalar_lea.vmem %s263_s21, 256 }
   0xb   :  { %v284_v57 = vld [vmem:[%s462_s6] ss:$0 sm:$0xff]  ;;  %p329_p0 = scmp.ne.s32.totalorder %s263_s21, %s328_s5  ;;  %p334_p2 = scmp.lt.s32.totalorder %s328_s5, %s328_s5 }
   0xc   :  { %306 = vmatpush3.bf16.msra.mxu1 %v322_v8 }
   0xd   :  { %307 = vmatprep.subr.bf16.mxu1 %v352_v1  ;;  %p335_p3 = por %p334_p2, %p333_p1 }
   0xf   :  { %p336_p4 = pnand %p335_p3, %p329_p0 }
  0x10   :  { %308 = vmatpush3.bf16.msra.mxu1 %v323_v9  ;;  %v115_v21 = vld [vmem:[#allocation2] sm:$0xff]  ;;  %v116_v23 = vld [vmem:[#allocation2 + $0x8] sm:$0xff] }
  0xdc   :  { %v106_v12 = vpop.f32.mrb[0].mxu0 }
  0xdd   :  { %v107_v13 = vadd.f32 %v274_v11, %v106_v12  ;;  %v299_v14 = vpop.f32.mrb[1].mxu0 }
  0xde   :  { %v109_v15 = vpop.f32.mrb[2].mxu0 }
  0xdf   :  { %v110_v16 = vadd.f32 %v274_v11, %v109_v15  ;;  %v300_v17 = vpop.f32.mrb[3].mxu0  ;;  %v113_v18 = vmax.f32 %v107_v13, 0.0 }
  0xe1   :  { %v114_v19 = vmax.f32 %v110_v16, 0.0 }
  0xe3   :  { %v117_v20 = vpack.c.bf16 %v114_v19, %v113_v18 }
  0xe5   :  { %310 = vmatmul.mubr.msk.bf16.vlgmr.msra.gmra.mrb[0].mxu1 %vm150_vm2, %v117_v20 }
 0x1b8   :  { %v188_v22 = vpop.f32.mrb[0].mxu1 }
 0x1b9   :  { %v195_v24 = vadd.f32 %v188_v22, %v115_v21  ;;  %v311_v25 = vpop.f32.mrb[1].mxu1 }
 0x1ba   :  { %v191_v26 = vpop.f32.mrb[2].mxu1 }
 0x1bb   :  { %197 = vst.msk [vmem:[#allocation2] sm:$0xff] %vm39_vm1, %v195_v24  ;;  %v196_v27 = vadd.f32 %v191_v26, %v116_v23  ;;  %v312_v28 = vpop.f32.mrb[3].mxu1 }
 0x1bd   :  { %198 = vst.msk [vmem:[#allocation2 + $0x8] sm:$0xff] %vm39_vm1, %v196_v27 }
 0x1c2   :  { %v202_v29 = vld [vmem:[#allocation2] sm:$0xff] }
 0x1c3   :  { %v204_v30 = vadd.f32 %v202_v29, %v42_v3 }
 0x1c4   :  { %v203_v31 = vld [vmem:[#allocation2 + $0x8] sm:$0xff] }
 0x1c5   :  { %v206_v32 = vsel %vm39_vm1, %v204_v30, 0.0  ;;  %v212_v33 = vmul.f32 %v204_v30, %v204_v30  ;;  %v205_v34 = vadd.f32 %v203_v31, %v43_v4 }
 0x1c6   :  { %207 = vadd.xlane.f32.xlu0 %v206_v32 }
 0x1c7   :  { %v214_v35 = vsel %vm39_vm1, %v212_v33, 0.0  ;;  %v213_v36 = vmul.f32 %v205_v34, %v205_v34  ;;  %v209_v37 = vsel %vm39_vm1, %v205_v34, 0.0 }
 0x1c8   :  { %215 = vadd.xlane.f32.xlu1 %v214_v35 }
 0x1c9   :  { %v217_v38 = vsel %vm39_vm1, %v213_v36, 0.0 }
 0x1ca   :  { %210 = vadd.xlane.f32.xlu0 %v209_v37 }
 0x1cc   :  { %218 = vadd.xlane.f32.xlu1 %v217_v38 }
 0x253   :  { %v208_v39 = vpop.xlane.xlu0 %207 }
 0x254   :  { %v221_v40 = vmul.f32 0.03125, %v208_v39 }
 0x255   :  { %v216_v41 = vpop.xlane.xlu1 %215 }
 0x256   :  { %v225_v42 = vmul.f32 %v221_v40, %v221_v40  ;;  %v223_v43 = vmul.f32 0.03125, %v216_v41  ;;  %v233_v53 = vsub.f32 %v204_v30, %v221_v40 }
 0x257   :  { %v211_v44 = vpop.xlane.xlu0 %210 }
 0x258   :  { %v227_v45 = vsub.f32 %v223_v43, %v225_v42  ;;  %v222_v46 = vmul.f32 0.03125, %v211_v44 }
 0x259   :  { %v219_v47 = vpop.xlane.xlu1 %218 }
 0x25a   :  { %v229_v48 = vadd.f32 1e-05, %v227_v45  ;;  %v226_v49 = vmul.f32 %v222_v46, %v222_v46  ;;  %v224_v50 = vmul.f32 0.03125, %v219_v47  ;;  %v234_v58 = vsub.f32 %v205_v34, %v222_v46 }
 0x25c   :  { %324 = vrsqrt.f32 %v229_v48  ;;  %v228_v51 = vsub.f32 %v224_v50, %v226_v49 }
 0x25e   :  { %v230_v52 = vadd.f32 1e-05, %v228_v51 }
 0x260   :  { %326 = vrsqrt.f32 %v230_v52 }
 0x266   :  { %v325_v54 = vpop.eup %324 }
 0x267   :  { %v235_v56 = vmul.f32 %v325_v54, %v233_v53 }
 0x269   :  { %v244_v59 = vmul.f32 %v283_v55, %v235_v56 }
 0x26a   :  { %v327_v60 = vpop.eup %326 }
 0x26b   :  { %v236_v61 = vmul.f32 %v327_v60, %v234_v58  ;;  %v253_v62 = vadd.f32 %v284_v57, %v244_v59 }
 0x26d   :  { %v245_v63 = vmul.f32 %v283_v55, %v236_v61  ;;  %255 = vst.msk [vmem:[#allocation3] sm:$0xff] %vm39_vm1, %v253_v62 }
 0x26f   :  { %v254_v0 = vadd.f32 %v284_v57, %v245_v63 }
 0x271   :  { %256 = vst.msk [vmem:[#allocation3 + $0x8] sm:$0xff] %vm39_vm1, %v254_v0 }
 0x272   :  { %339 = shalt.err (!%p336_p4)
}
 0x273   :  { %s340_s23 = scalar_lea.hbm %s463_s7, 256 }
 0x274   :  { %p341_p5 = scmp.ne.s32.totalorder %s463_s7, %s340_s23  ;;  %p344_p6 = scmp.lt.u32.totalorder %s340_s23, %s463_s7 }
 0x276   :  { %p346_p7 = pnand %p344_p6, %p341_p5 }
 0x278   :  { %349 = shalt.err (!%p346_p7)
}
 0x279   :  { %s355_s28 = smov 128   ;;  %s356_s29 = smov 8  }
 0x27a   :  { %268 = dma.vmem_to_hbm [thread:$0]  %s263_s21, 256, %s463_s7, [#allocation4], %s355_s28, %s355_s28, %s356_s29  }
 0x27b   :  { %350 = dma.done.wait [#allocation4], 256  }
 0x27c   :  { %351 = vsyncadd [#allocation4], 4294967040 }
 0x27d   :  { %272 = vsyncpa [#allocation4], 1 }

</bundles_post_ra>
